<compile_context>
chip_gen: v5e
topology: v5e:2x2
jax: 0.10.0
libtpu: 0.0.40
codegen_flags: <defaults>
</compile_context>

<pallas_src>
import functools

import numpy as np

import jax
import jax.numpy as jnp
from jax import lax
from jax.experimental import pallas as pl
from jax.experimental.pallas import tpu as pltpu


_VMEM_LIMIT_BYTES = 32 * 1024 * 1024   # explicit headroom on every generation


def _default_block_bytes():
    """~1 MiB tiles on v5e/v6e (already at roofline plateau), ~2 MiB on v7x."""
    try:
        kind = jax.devices()[0].device_kind.lower()
    except Exception:
        kind = ""
    if "v7" in kind or "tpu7" in kind:
        return 2 << 20
    return 1 << 20


def _sublane_multiple(itemsize):
    """Packed sublane count: 8 rows/f32, 16 rows/bf16/f16."""
    return 8 * max(1, 4 // int(itemsize))


# --------------------------------------------------------------------------- #
# Small-T path: whole (T, T) plane fits in one block; fold batch/head planes.
# --------------------------------------------------------------------------- #

def _small_flat_kernel(x_ref, o_ref, *, t):
    """Lane-dense layout (bblk, t*t). Predicate rebuilt from a flat iota.

    row = idx // t is recovered via f32 division + floor, which is exact here:
    idx < t*t <= 2048^2 < 2^24 (exact in f32) and the rounding error of the
    division (<= 0.5 ulp) is far smaller than the 1/t gap to the next integer.
    """
    x = x_ref[...]
    idx = lax.broadcasted_iota(jnp.int32, x.shape, 1)
    row = jnp.floor(idx.astype(jnp.float32) / jnp.float32(t)).astype(jnp.int32)
    col = idx - row * t
    o_ref[...] = jnp.where(col > row, jnp.array(-jnp.inf, dtype=x.dtype), x)


def _small_plane_kernel(x_ref, o_ref):
    """(bblk, t, t) layout for awkward t: predicate from two broadcasted iotas."""
    x = x_ref[...]
    row = lax.broadcasted_iota(jnp.int32, x.shape, 1)
    col = lax.broadcasted_iota(jnp.int32, x.shape, 2)
    o_ref[...] = jnp.where(col > row, jnp.array(-jnp.inf, dtype=x.dtype), x)


def _inf_mask_small(x3, t, lead, itemsize, plane_bytes, block_bytes):
    sub = _sublane_multiple(itemsize)
    # Lane-dense whenever the flattened last dim is a multiple of 128 (t <= 2048
    # keeps the f32 floor-division trick exact; the plane-size cutoff already
    # guarantees this in practice).
    flat = (t * t) % 128 == 0 and t <= 2048

    bblk = int(min(lead, max(1, block_bytes // max(1, plane_bytes))))
    if flat:
        if bblk < lead:  # sublane dim of the block: multiple of the packed count
            bblk = int(min(lead, max(sub, (bblk // sub) * sub)))
        xin = x3.reshape(lead, t * t)
        spec = pl.BlockSpec((bblk, t * t), lambda i: (i, 0))
        out_shape = jax.ShapeDtypeStruct((lead, t * t), x3.dtype)
        kernel = functools.partial(_small_flat_kernel, t=t)
    else:
        xin = x3
        spec = pl.BlockSpec((bblk, t, t), lambda i: (i, 0, 0))
        out_shape = jax.ShapeDtypeStruct((lead, t, t), x3.dtype)
        kernel = _small_plane_kernel

    out = pl.pallas_call(
        kernel,
        out_shape=out_shape,
        grid_spec=pltpu.PrefetchScalarGridSpec(
            num_scalar_prefetch=0,
            grid=(pl.cdiv(lead, bblk),),
            in_specs=[spec],
            out_specs=spec,
        ),
        input_output_aliases={0: 0},                 # in-place masked_fill_ semantics
        compiler_params=pltpu.CompilerParams(
            dimension_semantics=("parallel",),
            vmem_limit_bytes=_VMEM_LIMIT_BYTES,
        ),
    )(xin)
    return out.reshape(lead, t, t) if flat else out


# --------------------------------------------------------------------------- #
# Large-T path: tile the (T, T) plane, skip sub-diagonal tiles, splat-only for
# strictly-above-diagonal tiles (their input DMA is elided by pinning the
# input block index).
# --------------------------------------------------------------------------- #

def _tiled_masked_fill_kernel(rows_ref, cols_ref, xrows_ref, xcols_ref,
                              x_ref, o_ref, *, tm, tc):
    """One (1, tm, tc) tile of the (T, T) plane per grid step.

    rows/cols (SMEM, scalar-prefetched) are the OUTPUT tile's block coords; the
    mask is rebuilt from iotas offset by the tile's global start.  For tiles
    entirely above the diagonal the predicate is all-True in-bounds, so the
    (stale, pinned) contents of x_ref are never selected — the tile becomes a
    pure -inf splat with no fresh HBM read.
    """
    i = pl.program_id(1)
    r0 = rows_ref[i] * tm
    c0 = cols_ref[i] * tc
    row = r0 + lax.broadcasted_iota(jnp.int32, (tm, tc), 0)
    col = c0 + lax.broadcasted_iota(jnp.int32, (tm, tc), 1)
    x = x_ref[...]                                        # (1, tm, tc)
    o_ref[...] = jnp.where(col > row, jnp.array(-jnp.inf, dtype=x.dtype), x)


def _inf_mask_tiled(x3, t, lead, itemsize, block_bytes):
    sub = _sublane_multiple(itemsize)
    tc = int(min(512, ((t + 127) // 128) * 128))          # lane tile: multiple of 128
    tm = block_bytes // (tc * itemsize)
    tm = t if tm >= t else int(max(sub, (tm // sub) * sub))
    n_rb = pl.cdiv(t, tm)
    n_cb = pl.cdiv(t, tc)

    # Classify tiles against the strict upper triangle (col > row), using the
    # clipped (in-bounds) element ranges of each tile:
    #   * no upper element  -> never visited (alias preserves original values)
    #   * entirely upper    -> write-only -inf splat (no x read needed)
    #   * crosses diagonal  -> read + mask + write
    cross, above = [], []
    for r in range(int(n_rb)):
        r_lo = r * tm
        r_hi = min((r + 1) * tm, t) - 1
        for c in range(int(n_cb)):
            c_lo = c * tc
            c_hi = min((c + 1) * tc, t) - 1
            if c_hi <= r_lo:
                continue                                  # skipped entirely
            if c_lo > r_hi:
                above.append((r, c))                      # splat-only
            else:
                cross.append((r, c))                      # read + mask
    assert cross, "tiled path expects at least one diagonal-crossing tile"

    # Visit order: crossing tiles first, then above tiles.  Above tiles pin the
    # x BlockSpec index to the last crossing tile, so the pipeline sees an
    # unchanged input block index and issues no new input DMA for them.
    pin_r, pin_c = cross[-1]
    rows = np.asarray([rc[0] for rc in cross] + [rc[0] for rc in above], np.int32)
    cols = np.asarray([rc[1] for rc in cross] + [rc[1] for rc in above], np.int32)
    xrows = np.asarray([rc[0] for rc in cross] + [pin_r] * len(above), np.int32)
    xcols = np.asarray([rc[1] for rc in cross] + [pin_c] * len(above), np.int32)
    n_visit = rows.shape[0]

    out_spec = pl.BlockSpec((1, tm, tc), lambda b, i, rr, cc, xr, xc: (b, rr[i], cc[i]))
    x_spec = pl.BlockSpec((1, tm, tc), lambda b, i, rr, cc, xr, xc: (b, xr[i], xc[i]))
    kernel = functools.partial(_tiled_masked_fill_kernel, tm=tm, tc=tc)

    return pl.pallas_call(
        kernel,
        out_shape=jax.ShapeDtypeStruct((lead, t, t), x3.dtype),
        grid_spec=pltpu.PrefetchScalarGridSpec(
            num_scalar_prefetch=4,                        # rows, cols, xrows, xcols -> SMEM
            grid=(lead, n_visit),
            in_specs=[x_spec],
            out_specs=out_spec,
        ),
        input_output_aliases={4: 0},                      # x3 is call-arg 4 (after prefetch args)
        compiler_params=pltpu.CompilerParams(
            # Every step writes a distinct output tile, so both axes are truly
            # parallel; this lets v7x's 2 TensorCores split the tile axis.
            dimension_semantics=("parallel", "parallel"),
            vmem_limit_bytes=_VMEM_LIMIT_BYTES,
        ),
    )(jnp.asarray(rows), jnp.asarray(cols), jnp.asarray(xrows), jnp.asarray(xcols), x3)


# --------------------------------------------------------------------------- #
# Public entry point
# --------------------------------------------------------------------------- #

def inf_mask(x, *, block_bytes=None):
    """Set every strictly-upper-triangular element of the last two dims of x to -inf."""
    orig_shape = x.shape
    assert x.ndim >= 2 and orig_shape[-1] == orig_shape[-2], "expected (..., T, T) score tensor"
    assert x.dtype in (jnp.float32, jnp.bfloat16, jnp.float16), (
        "-inf fill needs a float dtype with an inf encoding, got %s" % x.dtype)
    if block_bytes is None:
        block_bytes = _default_block_bytes()

    t = int(orig_shape[-1])
    lead = int(np.prod(orig_shape[:-2], dtype=np.int64)) if x.ndim > 2 else 1
    itemsize = x.dtype.itemsize
    plane_bytes = t * t * itemsize
    x3 = x.reshape(lead, t, t)

    if plane_bytes >= 2 * block_bytes:
        out = _inf_mask_tiled(x3, t, lead, itemsize, block_bytes)
    else:
        out = _inf_mask_small(x3, t, lead, itemsize, plane_bytes, block_bytes)
    return out.reshape(orig_shape)


def _reference(x):
    t = x.shape[-1]
    tri = jnp.arange(t)[None, :] > jnp.arange(t)[:, None]          # col > row
    return jnp.where(tri, jnp.array(-jnp.inf, dtype=x.dtype), x)


if __name__ == "__main__":
    key = jax.random.PRNGKey(0)
    k1, k2, k3, k4, k5 = jax.random.split(key, 5)

    # 1) small attention-score shape (B, H, T, T): lane-dense flat small-T path
    B, H, T = 2, 4, 16
    x = jax.random.normal(k1, (B, H, T, T), dtype=jnp.float32)
    ref = _reference(x)                      # computed BEFORE the (aliasing) kernel call
    y = jax.block_until_ready(inf_mask(x))
    assert y.shape == (B, H, T, T) and y.dtype == x.dtype
    assert jnp.array_equal(y, ref), "flat small-T path mismatch vs reference"

    # 2) awkward T (t*t % 128 != 0): non-flattened small path
    x_odd = jax.random.normal(k2, (3, 200, 200), dtype=jnp.float32)
    ref_odd = _reference(x_odd)
    y_odd = jax.block_until_ready(inf_mask(x_odd))
    assert jnp.array_equal(y_odd, ref_odd), "plane small-T path mismatch vs reference"

    # 3) bf16 small path (dtype-aware sublane packing)
    x_bf = jax.random.normal(k3, (2, 256, 256), dtype=jnp.bfloat16)
    ref_bf = _reference(x_bf)
    y_bf = jax.block_until_ready(inf_mask(x_bf))
    assert y_bf.dtype == jnp.bfloat16
    assert jnp.array_equal(y_bf, ref_bf), "bf16 small-T path mismatch vs reference"

    # 4) tiled path, T divisible by tiles: sub-diagonal tiles skipped, above-diagonal splat-only
    x2 = jax.random.normal(k4, (2, 1024, 1024), dtype=jnp.float32)
    ref2 = _reference(x2)
    y2 = jax.block_until_ready(inf_mask(x2, block_bytes=1 << 20))
    assert jnp.array_equal(y2, ref2), "tiled path (divisible T) mismatch vs reference"

    # 5) tiled path, T NOT divisible by tile sizes (partial edge tiles)
    x3_ = jax.random.normal(k5, (1, 1000, 1000), dtype=jnp.float32)
    ref3 = _reference(x3_)
    y3 = jax.block_until_ready(inf_mask(x3_, block_bytes=1 << 20))
    assert jnp.array_equal(y3, ref3), "tiled path (non-divisible T) mismatch vs reference"

    print("KERNEL_OK")
</pallas_src>

<mosaic_0001>
module attributes {stable_mosaic.version = 11 : i64} {
  func.func @_small_flat_kernel(%arg0: i32, %arg1: memref<8x256xf32, #tpu.memory_space<vmem>>, %arg2: memref<8x256xf32, #tpu.memory_space<vmem>>) attributes {dimension_semantics = [#tpu.dimension_semantics<parallel>], iteration_bounds = array<i64: 1>, scalar_prefetch = 0 : i64, scratch_operands = 0 : i64, tpu.core_type = #tpu.core_type<tc>, window_params = [{transform_indices = @transform_0, window_bounds = array<i64: 8, 256>}, {transform_indices = @transform_1, window_bounds = array<i64: 8, 256>}]} {
    %c0 = arith.constant 0 : index
    %c0_0 = arith.constant 0 : index
    %0 = vector.load %arg1[%c0, %c0_0] : memref<8x256xf32, #tpu.memory_space<vmem>>, vector<8x256xf32>
    %1 = tpu.iota {dimensions = array<i32: 1>} : vector<8x256xi32>
    %2 = arith.sitofp %1 : vector<8x256xi32> to vector<8x256xf32>
    %cst = arith.constant 1.600000e+01 : f32
    %3 = vector.broadcast %cst : f32 to vector<8x256xf32>
    %4 = arith.divf %2, %3 : vector<8x256xf32>
    %5 = math.floor %4 : vector<8x256xf32>
    %6 = arith.fptosi %5 : vector<8x256xf32> to vector<8x256xi32>
    %c16_i32 = arith.constant 16 : i32
    %7 = vector.broadcast %c16_i32 : i32 to vector<8x256xi32>
    %8 = arith.muli %6, %7 : vector<8x256xi32>
    %9 = arith.subi %1, %8 : vector<8x256xi32>
    %10 = arith.cmpi sgt, %9, %6 : vector<8x256xi32>
    %cst_1 = arith.constant 0xFF800000 : f32
    %11 = vector.broadcast %cst_1 : f32 to vector<8x256xf32>
    %12 = arith.select %10, %11, %0 : vector<8x256xi1>, vector<8x256xf32>
    %c0_2 = arith.constant 0 : index
    %c0_3 = arith.constant 0 : index
    %13 = vector.load %arg2[%c0_2, %c0_3] : memref<8x256xf32, #tpu.memory_space<vmem>>, vector<8x256xf32>
    tpu.vector_store %arg2[%c0_2, %c0_3], %12 {strides = array<i32>} : memref<8x256xf32, #tpu.memory_space<vmem>>, vector<8x256xf32>,
    return
  }
  func.func @transform_0(%arg0: i32) -> (i32, i32) {
    %c0_i32 = arith.constant 0 : i32
    %c0_i32_0 = arith.constant 0 : i32
    return %arg0, %c0_i32 : i32, i32
  }
  func.func @transform_1(%arg0: i32) -> (i32, i32) {
    %c0_i32 = arith.constant 0 : i32
    %c0_i32_0 = arith.constant 0 : i32
    return %arg0, %c0_i32 : i32, i32
  }
}

</mosaic_0001>

<bundles_post_ra>
// kernel: tpu_custom_call.1
= control target key start
LH: loop header
LB: loop body
LE: loop exit
PB: predicated region body
PF: predicated region fallthrough
CT: control target
= control target key end

     0   :  { %6 = vsyncpa [#allocation3], 0  ;;  %s150_s0 = inlined_call_operand.hbm [shape: f32[8,256], index: 0, kind: input, shape index: {}, may-alias: {0,1}]   ;;  %s151_s1 = inlined_call_operand.hbm [shape: f32[8,256], index: 1, kind: output, shape index: {}, may-alias: {0,1}]  }
   0x1   :  { %7 = vsyncpa [#allocation4], 0  ;;  %s13_s8 = sshll.u32 %s150_s0, 4  ;;  %s131_s9 = smov [#allocation2]   ;;  %s14_s8 = int_to_ptr.hbm [resolvable:$true] %s13_s8 }
   0x2   :  { %s15_s10 = sshll.u32 %s131_s9, 4  ;;  %s16_s10 = int_to_ptr.vmem [resolvable:$true] %s15_s10 }
   0x3   :  { %18 = dma.hbm_to_vmem [thread:$0]  %s14_s8, 256, %s16_s10, [#allocation3]  }
   0x4   :  { %127 = dma.done.wait [#allocation3], 256  }
   0x5   :  { %128 = vsyncadd [#allocation3], 4294967040  ;;  %v25_v0 = vlaneseq  ;;  %v132_v1 = vmov 16.0   ;;  %v23_v20 = vld [vmem:[#allocation2] sm:$0xff]  ;;  %v24_v22 = vld [vmem:[#allocation2 + $0x8] sm:$0xff]  ;;  %s133_s0 = smov [#allocation5]  }
   0x6   :  { %77 = vrcp.f32 %v132_v1  ;;  %s58_s11 = sshll.u32 %s133_s0, 4  ;;  %s60_s14 = sshll.u32 %s151_s1, 4  ;;  %s59_s11 = int_to_ptr.vmem [resolvable:$true] %s58_s11  ;;  %s61_s14 = int_to_ptr.hbm [resolvable:$true] %s60_s14 }
   0x7   :  { %v26_v2 = vand.u32 127, %v25_v0 }
   0x9   :  { %v27_v5 = vadd.s32 128, %v26_v2  ;;  %v28_v8 = vcvt.s32.f32 %v26_v2 }
   0xb   :  { %v29_v9 = vcvt.s32.f32 %v27_v5 }
   0xc   :  { %v78_v3 = vpop.eup %77 }
   0xd   :  { %v31_v4 = vmul.f32 16.0, %v78_v3  ;;  %vm35_vm0 = vweird.f32 %v78_v3 }
   0xf   :  { %v32_v6 = vsub.f32 1.0, %v31_v4 }
  0x11   :  { %v33_v7 = vmul.f32 %v78_v3, %v32_v6 }
  0x13   :  { %v34_v10 = vadd.f32 %v78_v3, %v33_v7 }
  0x15   :  { %v36_v11 = vsel %vm35_vm0, %v78_v3, %v34_v10 }
  0x16   :  { %v37_v12 = vmul.f32 %v36_v11, %v28_v8  ;;  %v38_v13 = vmul.f32 %v36_v11, %v29_v9 }
  0x18   :  { %v39_v14 = vfloor.f32 %v37_v12  ;;  %v40_v15 = vfloor.f32 %v38_v13 }
  0x1a   :  { %v71_v16 = vcvt.f32.s32 %v39_v14  ;;  %v73_v17 = vcvt.f32.s32 %v40_v15 }
  0x1c   :  { %v43_v18 = vmul.u32 16, %v71_v16  ;;  %v44_v19 = vmul.u32 16, %v73_v17 }
  0x1e   :  { %v45_v21 = vsub.s32 %v26_v2, %v43_v18  ;;  %v46_v23 = vsub.s32 %v27_v5, %v44_v19 }
  0x20   :  { %vm47_vm1 = vcmp.gt.s32.totalorder %v45_v21, %v71_v16  ;;  %vm48_vm2 = vcmp.gt.s32.totalorder %v46_v23, %v73_v17 }
  0x21   :  { %v49_v24 = vsel %vm47_vm1, -inf, %v23_v20  ;;  %v50_v25 = vsel %vm48_vm2, -inf, %v24_v22 }
  0x22   :  { %51 = vst [vmem:[#allocation5] sm:$0xff] %v49_v24 }
  0x23   :  { %52 = vst [vmem:[#allocation5 + $0x8] sm:$0xff] %v50_v25 }
  0x24   :  { %63 = dma.vmem_to_hbm [thread:$0]  %s59_s11, 256, %s61_s14, [#allocation4]  }
  0x25   :  { %129 = dma.done.wait [#allocation4], 256  }
  0x26   :  { %130 = vsyncadd [#allocation4], 4294967040 }
  0x27   :  { %68 = vsyncpa [#allocation3], 1 }
  0x28   :  { %69 = vsyncpa [#allocation4], 1 }

</bundles_post_ra>
